<compile_context>
chip_gen: v7x
topology: tpu7x:2x2x1
jax: 0.10.0
libtpu: 0.0.40
codegen_flags: <defaults>
</compile_context>

<pallas_src>
import functools

import jax
import jax.numpy as jnp
from jax.experimental import pallas as pl
from jax.experimental.pallas import tpu as pltpu


def _sublane_quantum(dtype) -> int:
    """Minimum sublane multiple for a dense tile of this dtype (8/16/32)."""
    itemsize = jnp.dtype(dtype).itemsize
    return max(8, 32 // itemsize)


def _gather_kernel(idx_ref, feat_ref, o_ref, sem, *, n_rows, batch, tile):
    """One grid step gathers `tile` embedding rows.

    idx_ref : (B,) int32 node ids in SMEM (scalar prefetch).
    feat_ref: (N, D) embedding table left in HBM (memory_space=pl.ANY).
    o_ref   : (tile, D) output VMEM block for this step (DMA destination).
    sem     : single DMA semaphore shared by all row copies of this step.
    """
    step = pl.program_id(0)
    base = step * tile
    # Rows actually owned by this (possibly partial last) tile.
    valid = jnp.minimum(tile, batch - base)

    # Launch every row DMA of the tile before waiting, so many small copies
    # are outstanding at once; each row lands HBM -> o_ref directly.
    @pl.loop(0, valid)
    def _start(r):
        raw = idx_ref[base + r]
        nid = jnp.where(raw < 0, raw + n_rows, raw)   # PyTorch negative wrap
        nid = jnp.clip(nid, 0, n_rows - 1)            # OOB is unchecked on TPU
        pltpu.make_async_copy(feat_ref.at[nid], o_ref.at[r], sem).start()

    # Drain: each wait consumes one row's worth of bytes from the shared
    # semaphore, so after `valid` waits every copy above has completed.
    @pl.loop(0, valid)
    def _wait(r):
        pltpu.make_async_copy(feat_ref.at[0], o_ref.at[r], sem).wait()


def no_gnn_forward(features, nodes_batch, *, max_rows_per_step=None):
    """Equivalent of NoGNN.forward: features[nodes_batch]."""
    N, D = features.shape
    B = int(nodes_batch.shape[0])
    idx = nodes_batch.astype(jnp.int32)
    itemsize = jnp.dtype(features.dtype).itemsize
    quantum = _sublane_quantum(features.dtype)

    # Small-gather fast path: a handful of rows or a tiny table loses to the
    # fixed pallas_call cost -- let XLA index directly.
    if B < quantum or N * D * itemsize <= 256 * 1024:
        nid = jnp.where(idx < 0, idx + N, idx)
        return features[jnp.clip(nid, 0, N - 1)]

    # Rows per grid step: big enough to amortize per-step overhead and keep
    # many row DMAs in flight; small enough that the double-buffered output
    # tile stays a few MiB (well under v7x's 64 MiB VMEM, trivial on v5e/v6e).
    if max_rows_per_step is None:
        target_tile_bytes = 4 * 1024 * 1024
        max_rows_per_step = max(quantum,
                                min(512, target_tile_bytes // (D * itemsize)))
    tile = max(quantum, (min(max_rows_per_step, B) // quantum) * quantum)
    grid = pl.cdiv(B, tile)

    kernel = functools.partial(_gather_kernel, n_rows=N, batch=B, tile=tile)

    return pl.pallas_call(
        kernel,
        out_shape=jax.ShapeDtypeStruct((B, D), features.dtype),
        grid_spec=pltpu.PrefetchScalarGridSpec(
            num_scalar_prefetch=1,                        # node ids -> SMEM
            grid=(grid,),
            in_specs=[pl.BlockSpec(memory_space=pl.ANY)],  # table stays in HBM
            out_specs=pl.BlockSpec((tile, D), lambda s, idx_ref: (s, 0)),
            scratch_shapes=[pltpu.SemaphoreType.DMA(())],
        ),
        compiler_params=pltpu.CompilerParams(
            # Batch tiles are independent: lets v7x shard them across its
            # 2 TensorCores; harmless on single-TC v5e/v6e.
            dimension_semantics=("parallel",),
        ),
        cost_estimate=pl.CostEstimate(
            flops=0, transcendentals=0,
            bytes_accessed=2 * B * D * itemsize),
    )(idx, features)


if __name__ == "__main__":
    key = jax.random.PRNGKey(0)
    k_feat, k_idx = jax.random.split(key)

    # Deterministic synthetic parameters: `features` is NoGNN's nn.Parameter.
    N, D = 1024, 128        # node table (out_size = 128)
    B = 200                 # batch of node ids (exercises a partial last tile)
    features = jax.random.normal(k_feat, (N, D), dtype=jnp.float32)
    nodes_batch = jax.random.randint(k_idx, (B,), 0, N, dtype=jnp.int32)
    # Include a negative id to exercise PyTorch-style wrap-around indexing.
    nodes_batch = nodes_batch.at[3].set(-5)

    # Small max_rows_per_step forces several grid steps + a partial tile.
    out = no_gnn_forward(features, nodes_batch, max_rows_per_step=64)
    out = jax.block_until_ready(out)

    # Reference check (== torch features[nodes_batch], incl. negative wrap).
    norm = jnp.where(nodes_batch < 0, nodes_batch + N, nodes_batch)
    ref = features[norm]
    assert out.shape == (B, D)
    assert out.dtype == features.dtype
    assert bool(jnp.allclose(out, ref)), "Pallas gather mismatch vs reference"

    print("KERNEL_OK")
</pallas_src>

<mosaic_0001>
module attributes {stable_mosaic.version = 11 : i64} {
  func.func @_gather_kernel(%arg0: i32, %arg1: memref<200xi32, #tpu.memory_space<smem>>, %arg2: memref<1024x128xf32, #tpu.memory_space<any>>, %arg3: memref<64x128xf32, #tpu.memory_space<vmem>>, %arg4: memref<!tpu.dma_semaphore, #tpu.memory_space<semaphore_mem>>) attributes {dimension_semantics = [#tpu.dimension_semantics<parallel>], iteration_bounds = array<i64: 4>, scalar_prefetch = 1 : i64, scratch_operands = 1 : i64, tpu.core_type = #tpu.core_type<tc>, window_params = [{}, {transform_indices = @transform_1, window_bounds = array<i64: 64, 128>}]} {
    %c64_i32 = arith.constant 64 : i32
    %0 = arith.muli %arg0, %c64_i32 : i32
    %c200_i32 = arith.constant 200 : i32
    %1 = arith.subi %c200_i32, %0 : i32
    %c64_i32_0 = arith.constant 64 : i32
    %2 = arith.minsi %c64_i32_0, %1 : i32
    %c0_i32 = arith.constant 0 : i32
    %3 = arith.subi %2, %c0_i32 : i32
    %c1_i32 = arith.constant 1 : i32
    %c1_i32_1 = arith.constant 1 : i32
    %4 = arith.subi %c1_i32, %c1_i32_1 : i32
    %5 = arith.addi %3, %4 : i32
    %c1_i32_2 = arith.constant 1 : i32
    %6 = arith.divsi %5, %c1_i32_2 : i32
    %c1_i32_3 = arith.constant 1 : i32
    %c0_i32_4 = arith.constant 0 : i32
    %c0_i32_5 = arith.constant 0 : i32
    %7 = arith.subi %6, %c0_i32_5 : i32
    %8 = arith.addi %c0_i32_5, %7 : i32
    %c1_i32_6 = arith.constant 1 : i32
    scf.for %arg5 = %c0_i32_5 to %8 step %c1_i32_6  : i32 {
      %15 = arith.muli %arg5, %c1_i32_3 : i32
      %16 = arith.addi %c0_i32_4, %15 : i32
      %17 = arith.addi %0, %16 : i32
      %18 = arith.index_cast %17 : i32 to index
      %19 = memref.load %arg1[%18] : memref<200xi32, #tpu.memory_space<smem>>
      %c0_i32_15 = arith.constant 0 : i32
      %20 = arith.cmpi slt, %19, %c0_i32_15 : i32
      %c1024_i32 = arith.constant 1024 : i32
      %21 = arith.addi %19, %c1024_i32 : i32
      %22 = arith.select %20, %21, %19 : i32
      %c0_i32_16 = arith.constant 0 : i32
      %c1023_i32 = arith.constant 1023 : i32
      %23 = arith.maxsi %c0_i32_16, %22 : i32
      %24 = arith.minsi %c1023_i32, %23 : i32
      %c0_i32_17 = arith.constant 0 : i32
      %25 = tpu.memref_slice %arg2[%24, %c0_i32_17] : memref<1024x128xf32, #tpu.memory_space<any>> -> memref<1x128xf32, #tpu.memory_space<any>>
      %26 = tpu.memref_squeeze %25 : memref<1x128xf32, #tpu.memory_space<any>> -> memref<128xf32, #tpu.memory_space<any>>
      %c0_i32_18 = arith.constant 0 : i32
      %27 = tpu.memref_slice %arg3[%16, %c0_i32_18] : memref<64x128xf32, #tpu.memory_space<vmem>> -> memref<1x128xf32, #tpu.memory_space<vmem>>
      %28 = tpu.memref_squeeze %27 : memref<1x128xf32, #tpu.memory_space<vmem>> -> memref<128xf32, #tpu.memory_space<vmem>>
      tpu.enqueue_dma source(%26 : memref<128xf32, #tpu.memory_space<any>>) target(%28 : memref<128xf32, #tpu.memory_space<vmem>>) target_semaphore(%arg4 : memref<!tpu.dma_semaphore, #tpu.memory_space<semaphore_mem>>)
    }
    %c0_i32_7 = arith.constant 0 : i32
    %9 = arith.subi %2, %c0_i32_7 : i32
    %c1_i32_8 = arith.constant 1 : i32
    %c1_i32_9 = arith.constant 1 : i32
    %10 = arith.subi %c1_i32_8, %c1_i32_9 : i32
    %11 = arith.addi %9, %10 : i32
    %c1_i32_10 = arith.constant 1 : i32
    %12 = arith.divsi %11, %c1_i32_10 : i32
    %c1_i32_11 = arith.constant 1 : i32
    %c0_i32_12 = arith.constant 0 : i32
    %c0_i32_13 = arith.constant 0 : i32
    %13 = arith.subi %12, %c0_i32_13 : i32
    %14 = arith.addi %c0_i32_13, %13 : i32
    %c1_i32_14 = arith.constant 1 : i32
    scf.for %arg5 = %c0_i32_13 to %14 step %c1_i32_14  : i32 {
      %15 = arith.muli %arg5, %c1_i32_11 : i32
      %16 = arith.addi %c0_i32_12, %15 : i32
      %c0_i32_15 = arith.constant 0 : i32
      %c0_i32_16 = arith.constant 0 : i32
      %17 = tpu.memref_slice %arg2[%c0_i32_15, %c0_i32_16] : memref<1024x128xf32, #tpu.memory_space<any>> -> memref<1x128xf32, #tpu.memory_space<any>>
      %18 = tpu.memref_squeeze %17 : memref<1x128xf32, #tpu.memory_space<any>> -> memref<128xf32, #tpu.memory_space<any>>
      %c0_i32_17 = arith.constant 0 : i32
      %19 = tpu.memref_slice %arg3[%16, %c0_i32_17] : memref<64x128xf32, #tpu.memory_space<vmem>> -> memref<1x128xf32, #tpu.memory_space<vmem>>
      %20 = tpu.memref_squeeze %19 : memref<1x128xf32, #tpu.memory_space<vmem>> -> memref<128xf32, #tpu.memory_space<vmem>>
      tpu.wait_dma2 semaphore(%arg4 : memref<!tpu.dma_semaphore, #tpu.memory_space<semaphore_mem>>) src(%18 : memref<128xf32, #tpu.memory_space<any>>) dst(%20 : memref<128xf32, #tpu.memory_space<vmem>>)
    }
    return
  }
  func.func @transform_1(%arg0: i32, %arg1: memref<200xi32, #tpu.memory_space<smem>>) -> (i32, i32) {
    %c0_i32 = arith.constant 0 : i32
    %c0_i32_0 = arith.constant 0 : i32
    return %arg0, %c0_i32 : i32, i32
  }
}

</mosaic_0001>

<bundles_post_ra>
// kernel: tpu_custom_call.1
= control target key start
LH: loop header
LB: loop body
LE: loop exit
PB: predicated region body
PF: predicated region fallthrough
CT: control target
= control target key end

     0   :  { %s549_s0 = inlined_call_operand.hbm [shape: s32[200], index: 0, kind: input, shape index: {}]   ;;  %s550_s1 = inlined_call_operand.hbm [shape: f32[1024,128], index: 1, kind: input, shape index: {}]   ;;  %s551_s2 = inlined_call_operand.hbm [shape: f32[200,128], index: 2, kind: output, shape index: {}]  }
   0x1   :  { %s264_s11 = scalar_lea.hbm %s549_s0, 32 }
   0x2   :  { %p265_p0 = scmp.ne.s32.totalorder %s549_s0, %s264_s11  ;;  %p268_p1 = scmp.lt.u32.totalorder %s264_s11, %s549_s0 }
   0x4   :  { %p270_p2 = pnand %p268_p1, %p265_p0 }
   0x6   :  { %273 = shalt.err (!%p270_p2)  }
   0x7   :  { %s374_s16 = smov [#allocation4]  }
   0x8   :  { %8 = dma.hbm_to_smem %s549_s0, 32, %s374_s16, [#allocation3] }
   0x9   :  { %346 = dma.done.wait [#allocation3], 32 }
   0xa   :  { %347 = vsyncadd [#allocation3], 4294967264 }
   0xb   :  { %10 = sfence }
   0xc   :  { %11 = vsyncpa [#allocation6], 0 }
   0xd   :  { %13 = vsyncpa [#allocation6 + $0x1], 0  ;;  %s406_s19 = smov 0   ;;  %s408_s20 = smov 0  }
   0xe   :  { %s410_s21 = smov 0  }
   0xf LB: > { %s183_s0 = sadd.s32 4294967295, %s364_s21   ;;  %s423_s22 = sadd.s32 1, %s364_s21   ;;  %s364_s21 = sphi %s410_s21, %s558_s21   ;;  %s360_s20 = sphi %s408_s20, %s557_s20   ;;  %s356_s19 = sphi %s406_s19, %s556_s19  }
  0x10   : > { %s22_s23 = ssub.s32 %s364_s21, %s423_s22  ;;  %s25_s24 = sadd.s32 1, %s360_s20 }
  0x11   : > { %p23_p3 = scmp.eq.s32.totalorder %s22_s23, 0  ;;  %p184_p4 = scmp.ne.s32.totalorder %s22_s23, 0 }
  0x12   : > { %p29_p5 = scmp.eq.s32.totalorder %s364_s21, 3  ;;  %p34_p6 = scmp.ne.s32.totalorder %s360_s20, %s356_s19 }
  0x13   : > { %s432_s25 = scalar_select %p23_p3, %s360_s20, %s25_s24  }
  0x14   : > { %p434_p7 = por %p184_p4, %p29_p5  ;;  %p35_p8 = scmp.eq.s32.totalorder %s183_s0, 3 }
  0x15   : > { %p185_p10 = scmp.ge.s32.totalorder %s364_s21, 4 }
  0x16   : > { %p438_p9 = por %p35_p8, %p34_p6  ;;  %s49_s28 = sand.u32 (!%p185_p10), 1, %s360_s20  }
  0x17   : > { %44 = sbr.rel (%p185_p10) target bundleno = 140 (0x8c), region = 12  ;;  %s187_s29 = sshll.u32 (!%p185_p10), %s364_s21, 6 }
  0x18   : > { %s447_s30 = sshll.u32 (!%p185_p10), %s49_s28, 6  ;;  %s451_s3 = ssub.s32 (!%p185_p10), 200, %s187_s29 }
  0x19   : > { %p59_p11 = scmp.lt.s32.totalorder (!%p185_p10), %s451_s3, 64  ;;  %s51_s5 = scalar_lea.vmem (!%p185_p10), [#allocation5], %s447_s30 }
  0x1a   : > { %p552_p12 = scmp.le.s32.totalorder (!%p185_p10), %s451_s3, 0 }
  0x1e   : > { %s455_s4 = scalar_select %p59_p11, %s451_s3, 64 }
  0x1f   : > { %164 = sbr.rel (%p552_p12) target bundleno = 85 (0x55), region = 58  ;;  %s461_s6 = smov (!%p552_p12), 0  }
  0x26 LB: >> { %s67_s7 = sadd.s32 %s368_s6, %s187_s29  ;;  %s78_s10 = scalar_lea.vmem %s51_s5, %s368_s6 [#allocation5]  ;;  %s368_s6 = sphi %s461_s6, %s64_s6  }
  0x27   : >> { %s68_s8 = sld [smem:[#allocation4 + %s67_s7]]  ;;  %s86_s11 = sshll.u32 %s78_s10, 4  ;;  %s87_s11 = int_to_ptr.vmem [resolvable:$true] %s86_s11 }
  0x28   : >> { %s276_s0 = scalar_lea.hbm %s550_s1, 16384 }
  0x2d   : >> { %p69_p13 = scmp.lt.s32.totalorder %s68_s8, 0  ;;  %s70_s9 = sadd.s32 1024, %s68_s8 }
  0x2f   : >> { %s560_s9 = smov (!%p69_p13, %s70_s9), %s68_s8 }
  0x30   : >> { %p72_p0 = scmp.gt.s32.totalorder %s560_s9, 0  ;;  %p189_p1 = scmp.lt.s32.totalorder %s560_s9, 1023 }
  0x32   : >> { %s562_s9 = smov (!%p72_p0, %s560_s9), 0 }
  0x33   : >> { %s564_s9 = smov (!%p189_p1, %s562_s9), 1023 }
  0x34   : >> { %s194_s12 = sshll.u32 %s564_s9, 4 }
  0x35   : >> { %s77_s15 = scalar_lea.hbm %s550_s1, %s194_s12 }
  0x36   : >> { %s274_s16 = scalar_lea.hbm %s77_s15, 16  ;;  %p277_p3 = scmp.lt.u32.totalorder %s77_s15, %s550_s1 }
  0x37   : >> { %p275_p2 = scmp.ne.s32.totalorder %s77_s15, %s274_s16  ;;  %p278_p4 = scmp.lt.u32.totalorder %s276_s0, %s274_s16 }
  0x38   : >> { %p280_p6 = scmp.lt.u32.totalorder %s274_s16, %s77_s15 }
  0x39   : >> { %p279_p5 = por %p278_p4, %p277_p3 }
  0x3b   : >> { %p281_p8 = por %p280_p6, %p279_p5 }
  0x3d   : >> { %p282_p10 = pnand %p281_p8, %p275_p2 }
  0x3f   : >> { %285 = shalt.err (!%p282_p10)  }
  0x40   : >> { %s286_s7 = scalar_lea.vmem %s87_s11, 16  ;;  %s375_s8 = smov [#allocation5]  }
  0x41   : >> { %p287_p11 = scmp.ne.s32.totalorder %s87_s11, %s286_s7  ;;  %s288_s9 = sshll.u32 %s375_s8, 4  ;;  %s289_s9 = int_to_ptr.vmem [resolvable:$false] %s288_s9 }
  0x42   : >> { %s290_s10 = scalar_lea.vmem %s289_s9, 2048  ;;  %p291_p13 = scmp.lt.s32.totalorder %s87_s11, %s289_s9 }
  0x43   : >> { %p292_p0 = scmp.lt.s32.totalorder %s290_s10, %s286_s7 }
  0x45   : >> { %p293_p1 = por %p292_p0, %p291_p13 }
  0x47   : >> { %p294_p12 = pnand %p293_p1, %p287_p11 }
  0x49   : >> { %297 = shalt.err (!%p294_p12)  }
  0x4a   : >> { %89 = dma.hbm_to_vmem [thread:$0]  %s77_s15, 16, %s87_s11, [#allocation2] }
  0x4b   : >> { %s64_s6 = sadd.s32 1, %s368_s6  }
  0x4c   : >> { %p63_p3 = scmp.ge.s32.totalorder %s64_s6, %s455_s4 }
  0x4e   : > { %66 = sbr.rel (!%p63_p3) target bundleno = 38 (0x26), region = 64 }
  0x55 PF: > { %p555_p2 = scmp.le.s32.totalorder %s451_s3, 0 }
  0x56   : > { %s370_s12 = smov (!%p555_p2), 0  }
  0x57   : > { %169 = sbr.rel (%p555_p2) target bundleno = 105 (0x69), region = 69 }
  0x5e LB: >> { %348 = dma.done.wait [#allocation2], 16  ;;  %s372_s12 = sphi %s370_s12, %s93_s12  }
  0x5f   : >> { %349 = vsyncadd [#allocation2], 4294967280  ;;  %s93_s12 = sadd.s32 1, %s372_s12  }
  0x60   : >> { %p92_p12 = scmp.ge.s32.totalorder %s93_s12, %s455_s4 }
  0x62   : > { %95 = sbr.rel (!%p92_p12) target bundleno = 94 (0x5e), region = 75 }
  0x69 PF: > { %s490_s6 = scalar_lea.sflag [#allocation6], %s49_s28  ;;  %105 = sbr.rel (!%p434_p7) target bundleno = 140 (0x8c), region = 34 }
  0x6a   : > { %s197_s29 = sshll.u32 (%p434_p7), %s364_s21, 3 }
  0x6b   : > { %s107_s3 = ssub.s32 (%p434_p7), 25, %s197_s29 }
  0x6c   : > { %p108_p4 = scmp.lt.s32.totalorder (%p434_p7), %s107_s3, 8 }
  0x70   : > { %s566_s3 = smov (!%p108_p4, %s107_s3), 8 }
  0x71   : > { %s495_s11 = sshll.u32 %s566_s3, 7 }
  0x72   : > { %s112_s13 = ssub.s32 1024, %s495_s11 }
  0x73   : > { %113 = vsyncadd %s490_s6, %s112_s13  ;;  %p199_p5 = scmp.ne.s32.totalorder %s495_s11, 0  ;;  %s214_s28 = sshll.u32 %s364_s21, 10 }
  0x74   : > { %s504_s14 = scalar_lea.hbm %s551_s2, %s214_s28  ;;  %s118_s15 = sshll.u32 %s51_s5, 4  ;;  %s508_s15 = int_to_ptr.vmem [resolvable:$true] %s118_s15 }
  0x75   : > { %s298_s16 = scalar_lea.vmem %s508_s15, %s495_s11  ;;  %s376_s17 = smov [#allocation5]  }
  0x76   : > { %p299_p7 = scmp.ne.s32.totalorder %s508_s15, %s298_s16  ;;  %s302_s18 = sshll.u32 %s376_s17, 4  ;;  %s303_s18 = int_to_ptr.vmem [resolvable:$false] %s302_s18 }
  0x77   : > { %s304_s0 = scalar_lea.vmem %s303_s18, 2048  ;;  %p305_p10 = scmp.lt.s32.totalorder %s508_s15, %s303_s18 }
  0x78   : > { %p300_p6 = pnand %p299_p7, %p199_p5  ;;  %p306_p11 = scmp.lt.s32.totalorder %s304_s0, %s298_s16 }
  0x7a   : > { %p301_p8 = pneg %p300_p6  ;;  %p307_p13 = por %p306_p11, %p305_p10 }
  0x7c   : > { %p308_p0 = pnand %p307_p13, %p301_p8 }
  0x7e   : > { %311 = shalt.err (!%p308_p0)
}
  0x7f   : > { %s312_s30 = scalar_lea.hbm %s504_s14, %s495_s11  ;;  %s316_s24 = scalar_lea.hbm %s551_s2, 3200 }
  0x80   : > { %p313_p1 = scmp.ne.s32.totalorder %s504_s14, %s312_s30  ;;  %p317_p12 = scmp.lt.u32.totalorder %s504_s14, %s551_s2 }
  0x81   : > { %p318_p4 = scmp.lt.u32.totalorder %s316_s24, %s312_s30  ;;  %p320_p6 = scmp.lt.u32.totalorder %s312_s30, %s504_s14 }
  0x82   : > { %p314_p3 = pnand %p313_p1, %p199_p5 }
  0x83   : > { %p319_p7 = por %p318_p4, %p317_p12 }
  0x84   : > { %p315_p2 = pneg %p314_p3 }
  0x85   : > { %p321_p8 = por %p320_p6, %p319_p7 }
  0x87   : > { %p322_p10 = pnand %p321_p8, %p315_p2 }
  0x89   : > { %325 = shalt.err (!%p322_p10)
}
  0x8a   : > { %s377_s9 = smov 128   ;;  %s378_s10 = smov 8  }
  0x8b   : > { %124 = dma.vmem_to_hbm [thread:$0]  (%p199_p5), %s508_s15, %s495_s11, %s504_s14, %s490_s6, %s377_s9, %s377_s9, %s378_s10  }
  0x8c PF: > { %p220_p11 = scmp.ge.s32.totalorder %s364_s21, 1  ;;  %s133_s12 = sand.u32 1, %s356_s19  }
  0x8d   : > { %s134_s29 = scalar_lea.sflag [#allocation6], %s133_s12 }
  0x8e   : > { %p217_p13 = pnand %p220_p11, %p438_p9 }
  0x90   : > { %351 = dma.done.wait (!%p217_p13), %s134_s29, 1024  }
  0x91   : > { %353 = vsyncadd (!%p217_p13), %s134_s29, 4294966272  ;;  %p16_p0 = scmp.ge.s32.totalorder %s423_s22, 5   ;;  %s556_s19 = smov %s360_s20 }
  0x92   : > { %s557_s20 = smov %s432_s25  ;;  %s558_s21 = smov %s423_s22 }
  0x93   :  { %18 = sbr.rel (!%p16_p0) target bundleno = 15 (0xf), region = 86 }
  0x9a   :  { %139 = vsyncpa [#allocation6], 1 }
  0x9b   :  { %141 = vsyncpa [#allocation6 + $0x1], 1 }
  0x9c   :  { %142 = vsyncmov [#allocation2] }
  0x9f   :  { %s143_s21 = vpop.sfrf %142 }
  0xa0   :  { %p205_p9 = scmp.ne.s32.totalorder %s143_s21, 0 }
  0xa2   :  { %147 = shalt.err (%p205_p9)  }

</bundles_post_ra>
